<compile_context>
chip_gen: v5e
topology: v5e:2x2
jax: 0.10.0
libtpu: 0.0.40
codegen_flags: <defaults>
</compile_context>

<pallas_src>
import functools

import jax
import jax.numpy as jnp
from jax.experimental import pallas as pl
from jax.experimental.pallas import tpu as pltpu


def _round_up(x, m):
    return ((x + m - 1) // m) * m


def _pick_spatial_tile(mp):
    # Largest lane-dense tile that divides the (already 128-padded) pixel dim.
    for cand in (1024, 512, 256, 128):
        if mp % cand == 0:
            return cand
    return 128  # unreachable: mp is a multiple of 128


# ---------------------------------------------------------------------------
# Pallas kernel: one output tile of the transposed GEMM, bias fused.
# ---------------------------------------------------------------------------
def _aspp_gemm_kernel(p_ref, w_ref, b_ref, o_ref):
    """out^T tile = W^T @ patches^T tile + bias.

    p_ref : (1, Kp, tm)  bf16 patches^T tile (one image, one pixel tile)
    w_ref : (Op, Kp)     bf16 fused conv weights (VMEM-resident, constant map)
    b_ref : (Op, 1)      f32 summed conv bias   (VMEM-resident, constant map)
    o_ref : (1, Op, tm)  f32 output tile (Op in sublanes, pixels in lanes)
    """
    acc = jnp.dot(w_ref[...], p_ref[0], preferred_element_type=jnp.float32)
    o_ref[0] = acc + b_ref[...]


def _fused_dilated_conv_sum(patches_t, w_t, bias):
    """patches_t: (N, Kp, Mp) bf16, w_t: (Op, Kp) bf16, bias: (Op, 1) f32
       -> (N, Op, Mp) f32."""
    N, Kp, Mp = patches_t.shape
    Op = w_t.shape[0]
    tm = _pick_spatial_tile(Mp)

    return pl.pallas_call(
        _aspp_gemm_kernel,
        out_shape=jax.ShapeDtypeStruct((N, Op, Mp), jnp.float32),
        grid_spec=pltpu.PrefetchScalarGridSpec(
            num_scalar_prefetch=0,
            grid=(N, Mp // tm),
            in_specs=[
                pl.BlockSpec((1, Kp, tm), lambda n, j: (n, 0, j)),
                pl.BlockSpec((Op, Kp), lambda n, j: (0, 0)),   # weights resident
                pl.BlockSpec((Op, 1), lambda n, j: (0, 0)),    # bias resident
            ],
            out_specs=pl.BlockSpec((1, Op, tm), lambda n, j: (n, 0, j)),
        ),
        compiler_params=pltpu.CompilerParams(
            dimension_semantics=("parallel", "parallel"),
        ),
    )(patches_t, w_t, bias)


# ---------------------------------------------------------------------------
# Forward pass (matches Classifier_Module.forward)
# ---------------------------------------------------------------------------
@functools.partial(jax.jit, static_argnames=("dilations", "paddings"))
def classifier_module_forward(params, x, dilations, paddings):
    """x: NCHW float32.  Returns sum_i conv_i(x), NCHW float32."""
    N, C, H, W = x.shape
    out_hw = [(H + 2 * p - 2 * d, W + 2 * p - 2 * d)
              for d, p in zip(dilations, paddings)]
    Ho, Wo = out_hw[0]
    assert all(hw == (Ho, Wo) for hw in out_hw), (
        "all branch output sizes must match (required by the torch +=)")
    HoWo = Ho * Wo

    # im2col (still in XLA, see TODO at top): build patches^T directly from
    # NCHW x -- K feature order is (branch, kh, kw, c), pixel order (n, ho, wo).
    cols = []
    for d, p in zip(dilations, paddings):
        xp = jnp.pad(x, ((0, 0), (0, 0), (p, p), (p, p)))
        for kh in range(3):
            for kw in range(3):
                cols.append(
                    xp[:, :, kh * d:kh * d + Ho, kw * d:kw * d + Wo]
                    .reshape(N, C, HoWo))
    patches_t = jnp.concatenate(cols, axis=1)        # (N, K, Ho*Wo)
    K = patches_t.shape[1]

    # Fused weights: per branch (O, C, 3, 3) -> (O, 3, 3, C) -> (O, 9C);
    # concatenate along K over branches (matches the patch feature order).
    # Per-branch biases collapse into one summed bias vector.
    w_rows, b_sum = [], None
    for (w, b) in params["convs"]:
        w_rows.append(jnp.transpose(w, (0, 2, 3, 1)).reshape(w.shape[0], -1))
        b_sum = b if b_sum is None else b_sum + b
    w_t = jnp.concatenate(w_rows, axis=1)            # (O, K)
    no_labels = w_t.shape[0]

    # Pad: K to bf16 sublane packing, O to f32 sublanes, pixels to lane width.
    # (All three are no-ops for the configuration below.)
    Kp = _round_up(K, 16)
    Op = _round_up(no_labels, 8)
    Mp = _round_up(HoWo, 128)
    patches_t = jnp.pad(
        patches_t, ((0, 0), (0, Kp - K), (0, Mp - HoWo))).astype(jnp.bfloat16)
    w_t = jnp.pad(
        w_t, ((0, Op - no_labels), (0, Kp - K))).astype(jnp.bfloat16)
    bias = jnp.pad(b_sum, ((0, Op - no_labels),)).reshape(Op, 1)
    bias = bias.astype(jnp.float32)

    out_t = _fused_dilated_conv_sum(patches_t, w_t, bias)   # (N, Op, Mp) f32
    # (N, O, Ho*Wo) reshapes straight into NCHW -- no transpose needed.
    return out_t[:, :no_labels, :HoWo].reshape(N, no_labels, Ho, Wo)


# ---------------------------------------------------------------------------
# Pure-JAX reference (XLA dilated convs) for correctness checking
# ---------------------------------------------------------------------------
def _reference(params, x, dilations, paddings):
    out = None
    for (w, b), d, p in zip(params["convs"], dilations, paddings):
        y = jax.lax.conv_general_dilated(
            x, w,
            window_strides=(1, 1),
            padding=[(p, p), (p, p)],
            rhs_dilation=(d, d),
            dimension_numbers=("NCHW", "OIHW", "NCHW"),
        ) + b[None, :, None, None]
        out = y if out is None else out + y
    return out


# ---------------------------------------------------------------------------
# Deterministic synthetic parameters
# ---------------------------------------------------------------------------
def init_params(key, input_channel, no_labels, n_branches):
    params = {"convs": []}
    keys = jax.random.split(key, 2 * n_branches)
    bound = 1.0 / float((input_channel * 9) ** 0.5)
    for i in range(n_branches):
        # weight.data.normal_(0, 0.01) per the reference module
        w = 0.01 * jax.random.normal(
            keys[2 * i], (no_labels, input_channel, 3, 3), jnp.float32)
        b = jax.random.uniform(
            keys[2 * i + 1], (no_labels,), jnp.float32, -bound, bound)
        params["convs"].append((w, b))
    return params


# ---------------------------------------------------------------------------
if __name__ == "__main__":
    batch = 2
    input_channel = 16
    no_labels = 8
    spatial = 16
    dilations = (1, 2, 4, 6)
    paddings = (1, 2, 4, 6)  # padding == dilation -> spatial size preserved

    key = jax.random.PRNGKey(0)
    kp, kx = jax.random.split(key)
    params = init_params(kp, input_channel, no_labels, len(dilations))
    x = jax.random.normal(
        kx, (batch, input_channel, spatial, spatial), jnp.float32)

    out = classifier_module_forward(params, x, dilations, paddings)
    jax.block_until_ready(out)

    assert out.shape == (batch, no_labels, spatial, spatial)

    ref = _reference(params, x, dilations, paddings)
    max_err = float(jnp.max(jnp.abs(out - ref)))
    # bf16 operands (f32 accumulation) vs the XLA reference conv: ~1e-3-scale
    # differences on ~0.3-magnitude outputs are expected.
    assert max_err < 1e-2, f"mismatch vs XLA reference: max |err| = {max_err}"

    print("KERNEL_OK")
</pallas_src>

<mosaic_0001>
module attributes {stable_mosaic.version = 11 : i64} {
  func.func @_aspp_gemm_kernel(%arg0: i32, %arg1: i32, %arg2: memref<1x576x256xbf16, #tpu.memory_space<vmem>>, %arg3: memref<8x576xbf16, #tpu.memory_space<vmem>>, %arg4: memref<8x1xf32, #tpu.memory_space<vmem>>, %arg5: memref<1x8x256xf32, #tpu.memory_space<vmem>>) attributes {dimension_semantics = [#tpu.dimension_semantics<parallel>, #tpu.dimension_semantics<parallel>], iteration_bounds = array<i64: 2, 1>, scalar_prefetch = 0 : i64, scratch_operands = 0 : i64, tpu.core_type = #tpu.core_type<tc>, window_params = [{transform_indices = @transform_0, window_bounds = array<i64: 1, 576, 256>}, {pipeline_mode = #tpu.pipeline_mode<synchronous>, transform_indices = @transform_1, window_bounds = array<i64: 8, 576>}, {pipeline_mode = #tpu.pipeline_mode<synchronous>, transform_indices = @transform_2, window_bounds = array<i64: 8, 1>}, {transform_indices = @transform_3, window_bounds = array<i64: 1, 8, 256>}]} {
    %c0 = arith.constant 0 : index
    %c0_0 = arith.constant 0 : index
    %0 = vector.load %arg3[%c0, %c0_0] : memref<8x576xbf16, #tpu.memory_space<vmem>>, vector<8x576xbf16>
    %c0_1 = arith.constant 0 : index
    %c0_2 = arith.constant 0 : index
    %c0_3 = arith.constant 0 : index
    %1 = vector.load %arg2[%c0_1, %c0_2, %c0_3] : memref<1x576x256xbf16, #tpu.memory_space<vmem>>, vector<1x576x256xbf16>
    %2 = vector.shape_cast %1 : vector<1x576x256xbf16> to vector<576x256xbf16>
    %cst = arith.constant dense<0.000000e+00> : vector<8x256xf32>
    %3 = tpu.matmul %0, %2, %cst {dimension_numbers = #tpu.dot_dimension_numbers<[1], [0], [0], [1], [0, 0, 1, 1], [], []>} : vector<8x576xbf16>, vector<576x256xbf16>, vector<8x256xf32> -> vector<8x256xf32>
    %c0_4 = arith.constant 0 : index
    %c0_5 = arith.constant 0 : index
    %4 = vector.load %arg4[%c0_4, %c0_5] : memref<8x1xf32, #tpu.memory_space<vmem>>, vector<8x1xf32>
    %5 = vector.broadcast %4 : vector<8x1xf32> to vector<8x256xf32>
    %6 = arith.addf %3, %5 : vector<8x256xf32>
    %c0_6 = arith.constant 0 : index
    %c0_7 = arith.constant 0 : index
    %c0_8 = arith.constant 0 : index
    %7 = vector.load %arg5[%c0_6, %c0_7, %c0_8] : memref<1x8x256xf32, #tpu.memory_space<vmem>>, vector<1x8x256xf32>
    %8 = vector.shape_cast %7 : vector<1x8x256xf32> to vector<8x256xf32>
    %9 = vector.shape_cast %6 : vector<8x256xf32> to vector<1x8x256xf32>
    tpu.vector_store %arg5[%c0_6, %c0_7, %c0_8], %9 {strides = array<i32>} : memref<1x8x256xf32, #tpu.memory_space<vmem>>, vector<1x8x256xf32>,
    return
  }
  func.func @transform_0(%arg0: i32, %arg1: i32) -> (i32, i32, i32) {
    %c0_i32 = arith.constant 0 : i32
    %c0_i32_0 = arith.constant 0 : i32
    return %arg0, %c0_i32, %arg1 : i32, i32, i32
  }
  func.func @transform_1(%arg0: i32, %arg1: i32) -> (i32, i32) {
    %c0_i32 = arith.constant 0 : i32
    %c0_i32_0 = arith.constant 0 : i32
    %c0_i32_1 = arith.constant 0 : i32
    return %c0_i32, %c0_i32_0 : i32, i32
  }
  func.func @transform_2(%arg0: i32, %arg1: i32) -> (i32, i32) {
    %c0_i32 = arith.constant 0 : i32
    %c0_i32_0 = arith.constant 0 : i32
    %c0_i32_1 = arith.constant 0 : i32
    return %c0_i32, %c0_i32_0 : i32, i32
  }
  func.func @transform_3(%arg0: i32, %arg1: i32) -> (i32, i32, i32) {
    %c0_i32 = arith.constant 0 : i32
    %c0_i32_0 = arith.constant 0 : i32
    return %arg0, %c0_i32, %arg1 : i32, i32, i32
  }
}

</mosaic_0001>

<bundles_post_ra>
// kernel: classifier_module_forward.1
= control target key start
LH: loop header
LB: loop body
LE: loop exit
PB: predicated region body
PF: predicated region fallthrough
CT: control target
= control target key end

     0   :  { %s1337_s12 = smov 0   ;;  %s1339_s13 = smov 0   ;;  %s1554_s0 = inlined_call_operand.vmem [shape: bf16[2,576,256], index: 0, kind: input, shape index: {}]   ;;  %s1555_s1 = inlined_call_operand.vmem [shape: bf16[8,576], index: 1, kind: input, shape index: {}]   ;;  %s1556_s2 = inlined_call_operand.vmem [shape: f32[8,1], index: 2, kind: input, shape index: {}]   ;;  %s1557_s3 = inlined_call_operand.vmem [shape: f32[2,8,256], index: 3, kind: output, shape index: {}]  }
   0x1   :  { %s1341_s14 = smov 0  }
   0x2 LB: > { %s25_s15 = sadd.s32 1, %s1310_s13  ;;  %p896_p0 = scmp.ge.s32.totalorder %s1314_s14, 1  ;;  %s1314_s14 = sphi %s1341_s14, %s13_s14   ;;  %s1310_s13 = sphi %s1339_s13, %s1559_s13   ;;  %s1306_s12 = sphi %s1337_s12, %s1558_s12  }
   0x3   : > { %p27_p1 = scmp.ge.s32.totalorder %s25_s15, 2  ;;  %p158_p2 = scmp.lt.s32.totalorder %s1314_s14, 3 }
   0x5   : > { %s1561_s15 = smov (%p27_p1, %s25_s15), 0  ;;  %p159_p3 = pnand %p896_p0, %p158_p2 }
   0x6   : > { %p191_p4 = scmp.lt.s32.totalorder (!%p159_p3), %s1306_s12, 1 }
   0x7   : > { %162 = sbr.rel (%p159_p3) target bundleno = 233 (0xe9), region = 32 }
   0xc   : > { %s1563_s12 = smov (!%p191_p4, %s1306_s12), 1  ;;  %vm669_vm0 = vcmask 523264  }
   0xd   : > { %s1265_s16 = smul.u32 576, %s1563_s12  ;;  %s1192_s28 = sshll.u32 %s1563_s12, 4 }
   0xe   : > { %s208_s4 = scalar_lea.vmem %s1557_s3, %s1192_s28 }
   0xf   : > { %s1361_s19 = scalar_lea.vmem %s1554_s0, %s1265_s16 }
  0x10   : > { %v958_v0 = vld [vmem:[%s1361_s19 + $0x70] sm:$0xf]  ;;  %v1208_v1 = vld [vmem:[%s1361_s19 + $0x74] sm:$0xf0]  ;;  %v950_v11 = vld [vmem:[%s1361_s19 + $0x60] sm:$0xf] }
  0x11   : > { %v1022_v2 = vld [vmem:[%s1361_s19 + $0xf0] sm:$0xf]  ;;  %v959_v3 = vor.u32 %v1208_v1, %v958_v0  ;;  %v1224_v4 = vld [vmem:[%s1361_s19 + $0xf4] sm:$0xf0]  ;;  %v1206_v13 = vld [vmem:[%s1361_s19 + $0x64] sm:$0xf0] }
  0x12   : > { %v1086_v5 = vld [vmem:[%s1361_s19 + $0x170] sm:$0xf]  ;;  %v1240_v6 = vld [vmem:[%s1361_s19 + $0x174] sm:$0xf0]  ;;  %v1023_v7 = vor.u32 %v1224_v4, %v1022_v2  ;;  %v1014_v14 = vld [vmem:[%s1361_s19 + $0xe0] sm:$0xf]  ;;  %v951_v16 = vor.u32 %v1206_v13, %v950_v11 }
  0x13   : > { %v1087_v8 = vor.u32 %v1240_v6, %v1086_v5  ;;  %v1150_v9 = vld [vmem:[%s1361_s19 + $0x1f0] sm:$0xf]  ;;  %v1256_v10 = vld [vmem:[%s1361_s19 + $0x1f4] sm:$0xf0]  ;;  %673 = vmatpush.bf16.msra.mxu0 %v959_v3  ;;  %v1222_v15 = vld [vmem:[%s1361_s19 + $0xe4] sm:$0xf0] }
  0x14   : > { %v1151_v12 = vor.u32 %v1256_v10, %v1150_v9  ;;  %686 = vmatpush.bf16.msra.mxu1 %v1023_v7  ;;  %v1015_v17 = vor.u32 %v1222_v15, %v1014_v14  ;;  %v1078_v18 = vld [vmem:[%s1361_s19 + $0x160] sm:$0xf]  ;;  %v1238_v19 = vld [vmem:[%s1361_s19 + $0x164] sm:$0xf0]  ;;  %v942_v23 = vld [vmem:[%s1361_s19 + $0x50] sm:$0xf] }
  0x15   : > { %699 = vmatpush.bf16.msra.mxu2 %v1087_v8  ;;  %v1142_v20 = vld [vmem:[%s1361_s19 + $0x1e0] sm:$0xf]  ;;  %v1079_v21 = vor.u32 %v1238_v19, %v1078_v18  ;;  %v1254_v22 = vld [vmem:[%s1361_s19 + $0x1e4] sm:$0xf0]  ;;  %v1204_v24 = vld [vmem:[%s1361_s19 + $0x54] sm:$0xf0] }
  0x16   : > { %712 = vmatpush.bf16.msra.mxu3 %v1151_v12  ;;  %v1143_v25 = vor.u32 %v1254_v22, %v1142_v20  ;;  %v1006_v26 = vld [vmem:[%s1361_s19 + $0xd0] sm:$0xf]  ;;  %v1220_v27 = vld [vmem:[%s1361_s19 + $0xd4] sm:$0xf0]  ;;  %v943_v29 = vor.u32 %v1204_v24, %v942_v23  ;;  %v934_v35 = vld [vmem:[%s1361_s19 + $0x40] sm:$0xf] }
  0x17   : > { %v1070_v28 = vld [vmem:[%s1361_s19 + $0x150] sm:$0xf]  ;;  %674 = vmatpush.bf16.msra.mxu0 %v951_v16  ;;  %v1236_v30 = vld [vmem:[%s1361_s19 + $0x154] sm:$0xf0]  ;;  %v1007_v33 = vor.u32 %v1220_v27, %v1006_v26  ;;  %v1202_v36 = vld [vmem:[%s1361_s19 + $0x44] sm:$0xf0] }
  0x18   : > { %v1134_v31 = vld [vmem:[%s1361_s19 + $0x1d0] sm:$0xf]  ;;  %v1252_v32 = vld [vmem:[%s1361_s19 + $0x1d4] sm:$0xf0]  ;;  %687 = vmatpush.bf16.msra.mxu1 %v1015_v17  ;;  %v1071_v34 = vor.u32 %v1236_v30, %v1070_v28  ;;  %v998_v37 = vld [vmem:[%s1361_s19 + $0xc0] sm:$0xf]  ;;  %v935_v44 = vor.u32 %v1202_v36, %v934_v35 }
  0x19   : > { %700 = vmatpush.bf16.msra.mxu2 %v1079_v21  ;;  %v1135_v38 = vor.u32 %v1252_v32, %v1134_v31  ;;  %v1218_v39 = vld [vmem:[%s1361_s19 + $0xc4] sm:$0xf0]  ;;  %v1062_v40 = vld [vmem:[%s1361_s19 + $0x140] sm:$0xf]  ;;  %v926_v47 = vld [vmem:[%s1361_s19 + $0x30] sm:$0xf] }
  0x1a   : > { %713 = vmatpush.bf16.msra.mxu3 %v1143_v25  ;;  %v1234_v41 = vld [vmem:[%s1361_s19 + $0x144] sm:$0xf0]  ;;  %v1126_v42 = vld [vmem:[%s1361_s19 + $0x1c0] sm:$0xf]  ;;  %v999_v45 = vor.u32 %v1218_v39, %v998_v37  ;;  %v1200_v48 = vld [vmem:[%s1361_s19 + $0x34] sm:$0xf0] }
  0x1b   : > { %v1250_v43 = vld [vmem:[%s1361_s19 + $0x1c4] sm:$0xf0]  ;;  %675 = vmatpush.bf16.msra.mxu0 %v943_v29  ;;  %v1063_v46 = vor.u32 %v1234_v41, %v1062_v40  ;;  %v990_v49 = vld [vmem:[%s1361_s19 + $0xb0] sm:$0xf]  ;;  %v1216_v51 = vld [vmem:[%s1361_s19 + $0xb4] sm:$0xf0]  ;;  %v927_v56 = vor.u32 %v1200_v48, %v926_v47 }
  0x1c   : > { %688 = vmatpush.bf16.msra.mxu1 %v1007_v33  ;;  %v1127_v50 = vor.u32 %v1250_v43, %v1126_v42  ;;  %v1054_v52 = vld [vmem:[%s1361_s19 + $0x130] sm:$0xf]  ;;  %v1232_v53 = vld [vmem:[%s1361_s19 + $0x134] sm:$0xf0]  ;;  %v991_v57 = vor.u32 %v1216_v51, %v990_v49  ;;  %v918_v59 = vld [vmem:[%s1361_s19 + $0x20] sm:$0xf] }
  0x1d   : > { %701 = vmatpush.bf16.msra.mxu2 %v1071_v34  ;;  %v1118_v54 = vld [vmem:[%s1361_s19 + $0x1b0] sm:$0xf]  ;;  %v1248_v55 = vld [vmem:[%s1361_s19 + $0x1b4] sm:$0xf0]  ;;  %v1055_v58 = vor.u32 %v1232_v53, %v1054_v52  ;;  %v1198_v60 = vld [vmem:[%s1361_s19 + $0x24] sm:$0xf0] }
  0x1e   : > { %714 = vmatpush.bf16.msra.mxu3 %v1135_v38  ;;  %v982_v61 = vld [vmem:[%s1361_s19 + $0xa0] sm:$0xf]  ;;  %v1119_v62 = vor.u32 %v1248_v55, %v1118_v54  ;;  %v1214_v63 = vld [vmem:[%s1361_s19 + $0xa4] sm:$0xf0]  ;;  %v919_v4 = vor.u32 %v1198_v60, %v918_v59  ;;  %v910_v7 = vld [vmem:[%s1361_s19 + $0x10] sm:$0xf] }
  0x1f   : > { %676 = vmatpush.bf16.msra.mxu0 %v935_v44  ;;  %v1046_v0 = vld [vmem:[%s1361_s19 + $0x120] sm:$0xf]  ;;  %v1230_v1 = vld [vmem:[%s1361_s19 + $0x124] sm:$0xf0]  ;;  %v983_v5 = vor.u32 %v1214_v63, %v982_v61  ;;  %v1196_v8 = vld [vmem:[%s1361_s19 + $0x14] sm:$0xf0] }
  0x20   : > { %689 = vmatpush.bf16.msra.mxu1 %v999_v45  ;;  %v1110_v2 = vld [vmem:[%s1361_s19 + $0x1a0] sm:$0xf]  ;;  %v1246_v3 = vld [vmem:[%s1361_s19 + $0x1a4] sm:$0xf0]  ;;  %v1047_v6 = vor.u32 %v1230_v1, %v1046_v0  ;;  %v974_v9 = vld [vmem:[%s1361_s19 + $0x90] sm:$0xf]  ;;  %v911_v16 = vor.u32 %v1196_v8, %v910_v7 }
  0x21   : > { %702 = vmatpush.bf16.msra.mxu2 %v1063_v46  ;;  %v1111_v10 = vor.u32 %v1246_v3, %v1110_v2  ;;  %v1212_v11 = vld [vmem:[%s1361_s19 + $0x94] sm:$0xf0]  ;;  %v1038_v12 = vld [vmem:[%s1361_s19 + $0x110] sm:$0xf]  ;;  %v902_v17 = vld [vmem:[%s1361_s19] sm:$0xf] }
  0x22   : > { %715 = vmatpush.bf16.msra.mxu3 %v1127_v50  ;;  %v1228_v13 = vld [vmem:[%s1361_s19 + $0x114] sm:$0xf0]  ;;  %v1102_v14 = vld [vmem:[%s1361_s19 + $0x190] sm:$0xf]  ;;  %v1194_v18 = vld [vmem:[%s1361_s19 + $0x4] sm:$0xf0]  ;;  %v975_v20 = vor.u32 %v1212_v11, %v974_v9 }
  0x23   : > { %677 = vmatpush.bf16.msra.mxu0 %v927_v56  ;;  %v1244_v15 = vld [vmem:[%s1361_s19 + $0x194] sm:$0xf0]  ;;  %v966_v19 = vld [vmem:[%s1361_s19 + $0x80] sm:$0xf]  ;;  %v1039_v21 = vor.u32 %v1228_v13, %v1038_v12  ;;  %v1210_v22 = vld [vmem:[%s1361_s19 + $0x84] sm:$0xf0]  ;;  %v903_v32 = vor.u32 %v1194_v18, %v902_v17 }
  0x24   : > { %690 = vmatpush.bf16.msra.mxu1 %v991_v57  ;;  %v1030_v23 = vld [vmem:[%s1361_s19 + $0x100] sm:$0xf]  ;;  %v1226_v24 = vld [vmem:[%s1361_s19 + $0x104] sm:$0xf0]  ;;  %v1103_v25 = vor.u32 %v1244_v15, %v1102_v14  ;;  %v1182_v26 = vld [vmem:[%s1361_s19 + $0x230] sm:$0xf]  ;;  %v967_v37 = vor.u32 %v1210_v22, %v966_v19 }
  0x25   : > { %703 = vmatpush.bf16.msra.mxu2 %v1055_v58  ;;  %v1264_v27 = vld [vmem:[%s1361_s19 + $0x234] sm:$0xf0]  ;;  %v1207_v28 = vld [vmem:[%s1361_s19 + $0x74] sm:$0xf]  ;;  %v960_v29 = vld [vmem:[%s1361_s19 + $0x78] sm:$0xf0]  ;;  %v1031_v38 = vor.u32 %v1226_v24, %v1030_v23 }
  0x26   : > { %716 = vmatpush.bf16.msra.mxu3 %v1119_v62  ;;  %v1223_v30 = vld [vmem:[%s1361_s19 + $0xf4] sm:$0xf]  ;;  %v211_v31 = vld [vmem:[%s1555_s1] sm:$0xff]  ;;  %v1024_v33 = vld [vmem:[%s1361_s19 + $0xf8] sm:$0xf0]  ;;  %v1183_v42 = vor.u32 %v1264_v27, %v1182_v26  ;;  %v963_v43 = vor.u32 %v1207_v28, %v960_v29  ;;  %v1316_v26 = vmov 0  }
  0x27   : > { %678 = vmatpush.bf16.msra.mxu0 %v919_v4  ;;  %v1094_v34 = vld [vmem:[%s1361_s19 + $0x180] sm:$0xf]  ;;  %v1242_v35 = vld [vmem:[%s1361_s19 + $0x184] sm:$0xf0]  ;;  %v295_v36 = vunpack.c.l.b16 %v211_v31  ;;  %v1239_v39 = vld [vmem:[%s1361_s19 + $0x174] sm:$0xf]  ;;  %v296_v41 = vunpack.c.h.b16 %v211_v31  ;;  %v1027_v46 = vor.u32 %v1223_v30, %v1024_v33  ;;  %1291 = vset.pattern.permute.xlu0 %v1316_v26 }
  0x28   : > { %691 = vmatpush.bf16.msra.mxu1 %v983_v5  ;;  %v1088_v40 = vld [vmem:[%s1361_s19 + $0x178] sm:$0xf0]  ;;  %v1174_v44 = vld [vmem:[%s1361_s19 + $0x220] sm:$0xf]  ;;  %v212_v45 = vld [vmem:[%s1555_s1 + $0x8] sm:$0xff]  ;;  %v1095_v47 = vor.u32 %v1242_v35, %v1094_v34 }
  0x29   : > { %704 = vmatpush.bf16.msra.mxu2 %v1047_v6  ;;  %v1262_v48 = vld [vmem:[%s1361_s19 + $0x224] sm:$0xf0]  ;;  %v1205_v49 = vld [vmem:[%s1361_s19 + $0x64] sm:$0xf]  ;;  %v952_v50 = vld [vmem:[%s1361_s19 + $0x68] sm:$0xf0]  ;;  %v297_v51 = vunpack.c.l.b16 %v212_v45  ;;  %v298_v52 = vunpack.c.h.b16 %v212_v45  ;;  %v1091_v53 = vor.u32 %v1239_v39, %v1088_v40  ;;  %v1447_v56 = vpack.c.b16 %v295_v36, %v295_v36 }
  0x2a   : > { %717 = vmatpush.bf16.msra.mxu3 %v1111_v10  ;;  %v1221_v54 = vld [vmem:[%s1361_s19 + $0xe4] sm:$0xf]  ;;  %v1016_v55 = vld [vmem:[%s1361_s19 + $0xe8] sm:$0xf0]  ;;  %v1451_v59 = vpack.c.b16 %v296_v41, %v296_v41  ;;  %v1175_v61 = vor.u32 %v1262_v48, %v1174_v44  ;;  %v955_v62 = vor.u32 %v1205_v49, %v952_v50  ;;  %v1166_v63 = vld [vmem:[%s1361_s19 + $0x210] sm:$0xf] }
  0x2b   : > { %679 = vmatpush.bf16.msra.mxu0 %v911_v16  ;;  %v1237_v57 = vld [vmem:[%s1361_s19 + $0x164] sm:$0xf]  ;;  %v1080_v58 = vld [vmem:[%s1361_s19 + $0x168] sm:$0xf0]  ;;  %v1453_v60 = vpack.c.b16 %v297_v51, %v297_v51  ;;  %v1019_v0 = vor.u32 %v1221_v54, %v1016_v55  ;;  %v1260_v1 = vld [vmem:[%s1361_s19 + $0x214] sm:$0xf0]  ;;  %v1459_v4 = vpack.c.b16 %v298_v52, %v298_v52 }
  0x2c   : > { %692 = vmatpush.bf16.msra.mxu1 %v975_v20  ;;  %v1203_v2 = vld [vmem:[%s1361_s19 + $0x54] sm:$0xf]  ;;  %v944_v3 = vld [vmem:[%s1361_s19 + $0x58] sm:$0xf0]  ;;  %v1083_v5 = vor.u32 %v1237_v57, %v1080_v58  ;;  %v1167_v10 = vor.u32 %v1260_v1, %v1166_v63  ;;  %v1158_v12 = vld [vmem:[%s1361_s19 + $0x200] sm:$0xf] }
  0x2d   : > { %705 = vmatpush.bf16.msra.mxu2 %v1039_v21  ;;  %v1219_v6 = vld [vmem:[%s1361_s19 + $0xd4] sm:$0xf]  ;;  %v1008_v7 = vld [vmem:[%s1361_s19 + $0xd8] sm:$0xf0]  ;;  %v947_v11 = vor.u32 %v1203_v2, %v944_v3  ;;  %v1258_v13 = vld [vmem:[%s1361_s19 + $0x204] sm:$0xf0] }
  0x2e   : > { %718 = vmatpush.bf16.msra.mxu3 %v1103_v25  ;;  %v1235_v8 = vld [vmem:[%s1361_s19 + $0x154] sm:$0xf]  ;;  %v1072_v9 = vld [vmem:[%s1361_s19 + $0x158] sm:$0xf0]  ;;  %v1201_v14 = vld [vmem:[%s1361_s19 + $0x44] sm:$0xf]  ;;  %v1011_v15 = vor.u32 %v1219_v6, %v1008_v7  ;;  %v1159_v27 = vor.u32 %v1258_v13, %v1158_v12 }
  0x2f   : > { %680 = vmatpush.bf16.msra.mxu0 %v903_v32  ;;  %v936_v16 = vld [vmem:[%s1361_s19 + $0x48] sm:$0xf0]  ;;  %v1217_v17 = vld [vmem:[%s1361_s19 + $0xc4] sm:$0xf]  ;;  %v1075_v19 = vor.u32 %v1235_v8, %v1072_v9  ;;  %v1255_v20 = vld [vmem:[%s1361_s19 + $0x1f4] sm:$0xf] }
  0x30   : > { %693 = vmatpush.bf16.msra.mxu1 %v967_v37  ;;  %v1000_v18 = vld [vmem:[%s1361_s19 + $0xc8] sm:$0xf0]  ;;  %v1152_v21 = vld [vmem:[%s1361_s19 + $0x1f8] sm:$0xf0]  ;;  %v286_v22 = vld [vmem:[%s1556_s2] sm:$0xff]  ;;  %v939_v28 = vor.u32 %v1201_v14, %v936_v16 }
  0x31   : > { %706 = vmatpush.bf16.msra.mxu2 %v1031_v38  ;;  %v1233_v23 = vld [vmem:[%s1361_s19 + $0x144] sm:$0xf]  ;;  %v1064_v24 = vld [vmem:[%s1361_s19 + $0x148] sm:$0xf0]  ;;  %v213_v25 = vld [vmem:[%s1555_s1 + $0x10] sm:$0xf]  ;;  %v1003_v29 = vor.u32 %v1217_v17, %v1000_v18  ;;  %v1155_v30 = vor.u32 %v1255_v20, %v1152_v21  ;;  %289 = vperm.xlu0 %1291, %v286_v22  }
  0x32   : > { %719 = vmatpush.bf16.msra.mxu3 %v1095_v47  ;;  %681 = vmatmul.bf16.vlgmr.msra.gmra.mxu0 %v1447_v56  ;;  %v1199_v31 = vld [vmem:[%s1361_s19 + $0x34] sm:$0xf]  ;;  %v928_v32 = vld [vmem:[%s1361_s19 + $0x38] sm:$0xf0]  ;;  %v1067_v34 = vor.u32 %v1233_v23, %v1064_v24  ;;  %v1253_v36 = vld [vmem:[%s1361_s19 + $0x1e4] sm:$0xf]  ;;  %v299_v38 = vunpack.c.l.b16 %v213_v25 }
  0x33   : > { %729 = vmatpush.bf16.msrb.mxu0 %v1183_v42  ;;  %694 = vmatmul.bf16.vlgmr.msra.gmra.mxu1 %v1451_v59  ;;  %v1215_v33 = vld [vmem:[%s1361_s19 + $0xb4] sm:$0xf]  ;;  %v992_v35 = vld [vmem:[%s1361_s19 + $0xb8] sm:$0xf0]  ;;  %v1144_v37 = vld [vmem:[%s1361_s19 + $0x1e8] sm:$0xf0]  ;;  %v931_v41 = vor.u32 %v1199_v31, %v928_v32 }
  0x34   : > { %738 = vmatpush.bf16.msrb.mxu1 %v963_v43  ;;  %707 = vmatmul.bf16.vlgmr.msra.gmra.mxu2 %v1453_v60  ;;  %v1231_v39 = vld [vmem:[%s1361_s19 + $0x134] sm:$0xf]  ;;  %v1056_v40 = vld [vmem:[%s1361_s19 + $0x138] sm:$0xf0]  ;;  %v995_v42 = vor.u32 %v1215_v33, %v992_v35  ;;  %v1147_v43 = vor.u32 %v1253_v36, %v1144_v37  ;;  %v1197_v44 = vld [vmem:[%s1361_s19 + $0x24] sm:$0xf]  ;;  %v1497_v49 = vpack.c.b16 %v299_v38, %v299_v38 }
  0x35   : > { %751 = vmatpush.bf16.msrb.mxu2 %v1027_v46  ;;  %720 = vmatmul.bf16.vlgmr.msra.gmra.mxu3 %v1459_v4  ;;  %v920_v45 = vld [vmem:[%s1361_s19 + $0x28] sm:$0xf0]  ;;  %v1213_v46 = vld [vmem:[%s1361_s19 + $0xa4] sm:$0xf]  ;;  %v1059_v47 = vor.u32 %v1231_v39, %v1056_v40  ;;  %v1251_v50 = vld [vmem:[%s1361_s19 + $0x1d4] sm:$0xf] }
  0x36   : > { %764 = vmatpush.bf16.msrb.mxu3 %v1091_v53  ;;  %v984_v48 = vld [vmem:[%s1361_s19 + $0xa8] sm:$0xf0]  ;;  %v1136_v51 = vld [vmem:[%s1361_s19 + $0x1d8] sm:$0xf0]  ;;  %v1229_v52 = vld [vmem:[%s1361_s19 + $0x124] sm:$0xf]  ;;  %v923_v54 = vor.u32 %v1197_v44, %v920_v45 }
  0x37   : > { %730 = vmatpush.bf16.msrb.mxu0 %v1175_v61  ;;  %v1048_v53 = vld [vmem:[%s1361_s19 + $0x128] sm:$0xf0]  ;;  %v987_v55 = vor.u32 %v1213_v46, %v984_v48  ;;  %v1139_v57 = vor.u32 %v1251_v50, %v1136_v51  ;;  %v1195_v58 = vld [vmem:[%s1361_s19 + $0x14] sm:$0xf]  ;;  %v912_v61 = vld [vmem:[%s1361_s19 + $0x18] sm:$0xf0] }
  0x38   : > { %739 = vmatpush.bf16.msrb.mxu1 %v955_v62  ;;  %v1211_v62 = vld [vmem:[%s1361_s19 + $0x94] sm:$0xf]  ;;  %v1051_v63 = vor.u32 %v1229_v52, %v1048_v53  ;;  %v1249_v1 = vld [vmem:[%s1361_s19 + $0x1c4] sm:$0xf]  ;;  %v1128_v2 = vld [vmem:[%s1361_s19 + $0x1c8] sm:$0xf0]  ;;  %v915_v6 = vor.u32 %v1195_v58, %v912_v61 }
  0x39   : > { %752 = vmatpush.bf16.msrb.mxu2 %v1019_v0  ;;  %v976_v0 = vld [vmem:[%s1361_s19 + $0x98] sm:$0xf0]  ;;  %v1227_v3 = vld [vmem:[%s1361_s19 + $0x114] sm:$0xf]  ;;  %v1193_v7 = vld [vmem:[%s1361_s19 + $0x4] sm:$0xf]  ;;  %v1131_v9 = vor.u32 %v1249_v1, %v1128_v2 }
  0x3a   : > { %765 = vmatpush.bf16.msrb.mxu3 %v1083_v5  ;;  %v1040_v5 = vld [vmem:[%s1361_s19 + $0x118] sm:$0xf0]  ;;  %v979_v8 = vor.u32 %v1211_v62, %v976_v0  ;;  %v968_v12 = vld [vmem:[%s1361_s19 + $0x88] sm:$0xf0]  ;;  %v1247_v14 = vld [vmem:[%s1361_s19 + $0x1b4] sm:$0xf] }
  0x3b   : > { %731 = vmatpush.bf16.msrb.mxu0 %v1167_v10  ;;  %v904_v10 = vld [vmem:[%s1361_s19 + $0x8] sm:$0xf0]  ;;  %v1043_v13 = vor.u32 %v1227_v3, %v1040_v5  ;;  %v1225_v16 = vld [vmem:[%s1361_s19 + $0x104] sm:$0xf]  ;;  %v1263_v18 = vld [vmem:[%s1361_s19 + $0x234] sm:$0xf] }
  0x3c   : > { %740 = vmatpush.bf16.msrb.mxu1 %v947_v11  ;;  %v1209_v11 = vld [vmem:[%s1361_s19 + $0x84] sm:$0xf]  ;;  %v1032_v17 = vld [vmem:[%s1361_s19 + $0x108] sm:$0xf0]  ;;  %v907_v20 = vor.u32 %v1193_v7, %v904_v10  ;;  %v1243_v31 = vld [vmem:[%s1361_s19 + $0x194] sm:$0xf] }
  0x3d   : > { %753 = vmatpush.bf16.msrb.mxu2 %v1011_v15  ;;  %v1120_v15 = vld [vmem:[%s1361_s19 + $0x1b8] sm:$0xf0]  ;;  %v971_v21 = vor.u32 %v1209_v11, %v968_v12  ;;  %v1035_v23 = vor.u32 %v1225_v16, %v1032_v17  ;;  %v1245_v25 = vld [vmem:[%s1361_s19 + $0x1a4] sm:$0xf]  ;;  %v1112_v26 = vld [vmem:[%s1361_s19 + $0x1a8] sm:$0xf0] }
  0x3e   : > { %766 = vmatpush.bf16.msrb.mxu3 %v1075_v19  ;;  %v1184_v19 = vld [vmem:[%s1361_s19 + $0x238] sm:$0xf0]  ;;  %v1123_v22 = vor.u32 %v1247_v14, %v1120_v15  ;;  %v1259_v33 = vld [vmem:[%s1361_s19 + $0x214] sm:$0xf]  ;;  %v1241_v37 = vld [vmem:[%s1361_s19 + $0x184] sm:$0xf] }
  0x3f   : > { %732 = vmatpush.bf16.msrb.mxu0 %v1159_v27  ;;  %v1187_v24 = vor.u32 %v1263_v18, %v1184_v19  ;;  %v1261_v27 = vld [vmem:[%s1361_s19 + $0x224] sm:$0xf]  ;;  %v1104_v32 = vld [vmem:[%s1361_s19 + $0x198] sm:$0xf0]  ;;  %v1096_v38 = vld [vmem:[%s1361_s19 + $0x188] sm:$0xf0] }
  0x40   : > { %741 = vmatpush.bf16.msrb.mxu1 %v939_v28  ;;  %v1176_v28 = vld [vmem:[%s1361_s19 + $0x228] sm:$0xf0]  ;;  %v1107_v35 = vor.u32 %v1243_v31, %v1104_v32  ;;  %v1257_v39 = vld [vmem:[%s1361_s19 + $0x204] sm:$0xf] }
  0x41   : > { %754 = vmatpush.bf16.msrb.mxu2 %v1003_v29  ;;  %v1115_v29 = vor.u32 %v1245_v25, %v1112_v26  ;;  %v1160_v40 = vld [vmem:[%s1361_s19 + $0x208] sm:$0xf0] }
  0x42   : > { %767 = vmatpush.bf16.msrb.mxu3 %v1067_v34  ;;  %1188 = vmatmul.msk.bf16.vlgmr.msrb.gmra.mxu0 %vm669_vm0, %v1497_v49  ;;  %v1168_v34 = vld [vmem:[%s1361_s19 + $0x218] sm:$0xf0] }
  0x43   : > { %777 = vmatpush.bf16.msra.mxu0 %v1155_v30  ;;  %v1179_v30 = vor.u32 %v1261_v27, %v1176_v28  ;;  %v1171_v36 = vor.u32 %v1259_v33, %v1168_v34 }
  0x44   : > { %742 = vmatpush.bf16.msrb.mxu1 %v931_v41  ;;  %v1099_v41 = vor.u32 %v1241_v37, %v1096_v38 }
  0x45   : > { %755 = vmatpush.bf16.msrb.mxu2 %v995_v42  ;;  %v1163_v42 = vor.u32 %v1257_v39, %v1160_v40 }
  0x46   : > { %768 = vmatpush.bf16.msrb.mxu3 %v1059_v47 }
  0x47   : > { %778 = vmatpush.bf16.msra.mxu0 %v1147_v43 }
  0x48   : > { %743 = vmatpush.bf16.msrb.mxu1 %v923_v54 }
  0x49   : > { %756 = vmatpush.bf16.msrb.mxu2 %v987_v55 }
  0x4a   : > { %769 = vmatpush.bf16.msrb.mxu3 %v1051_v63 }
  0x4b   : > { %779 = vmatpush.bf16.msra.mxu0 %v1139_v57 }
  0x4c   : > { %744 = vmatpush.bf16.msrb.mxu1 %v915_v6 }
  0x4d   : > { %757 = vmatpush.bf16.msrb.mxu2 %v979_v8 }
  0x4e   : > { %770 = vmatpush.bf16.msrb.mxu3 %v1043_v13 }
  0x4f   : > { %780 = vmatpush.bf16.msra.mxu0 %v1131_v9 }
  0x50   : > { %745 = vmatpush.bf16.msrb.mxu1 %v907_v20 }
  0x51   : > { %758 = vmatpush.bf16.msrb.mxu2 %v971_v21 }
  0x52   : > { %771 = vmatpush.bf16.msrb.mxu3 %v1035_v23 }
  0x53   : > { %781 = vmatpush.bf16.msra.mxu0 %v1123_v22  ;;  %746 = vmatmul.bf16.vlgmr.msrb.gmra.mxu1 %v1447_v56 }
  0x54   : > { %794 = vmatpush.bf16.msra.mxu1 %v1187_v24  ;;  %759 = vmatmul.bf16.vlgmr.msrb.gmra.mxu2 %v1451_v59 }
  0x55   : > { %772 = vmatmul.bf16.vlgmr.msrb.gmra.mxu3 %v1453_v60 }
  0x57   : > { %782 = vmatpush.bf16.msra.mxu0 %v1115_v29 }
  0x58   : > { %795 = vmatpush.bf16.msra.mxu1 %v1179_v30 }
  0x5b   : > { %783 = vmatpush.bf16.msra.mxu0 %v1107_v35 }
  0x5c   : > { %796 = vmatpush.bf16.msra.mxu1 %v1171_v36 }
  0x5f   : > { %784 = vmatpush.bf16.msra.mxu0 %v1099_v41 }
  0x60   : > { %797 = vmatpush.bf16.msra.mxu1 %v1163_v42 }
  0x62   : > { %785 = vmatmul.bf16.vlgmr.msra.gmra.mxu0 %v1459_v4 }
  0x63   : > { %1189 = vmatmul.msk.bf16.vlgmr.msra.gmra.mxu1 %vm669_vm0, %v1497_v49 }
  0xa3   : > { %v290_v56 = vpop.permute.xlu0 %289 }
  0xaf   : > { %v682_v59 = vpop.f32.mrf.mxu0 }
  0xb0   : > { %v695_v60 = vpop.f32.mrf.mxu1  ;;  %v683_v43 = vadd.f32 %v682_v59, %v290_v56 }
  0xb2   : > { %v696_v44 = vadd.f32 %v695_v60, %v683_v43 }
  0xb7   : > { %v708_v45 = vpop.f32.mrf.mxu2  ;;  %v684_v46 = vpop.f32.mrf.mxu0 }
  0xb8   : > { %v697_v47 = vpop.f32.mrf.mxu1  ;;  %v709_v48 = vadd.f32 %v708_v45, %v696_v44  ;;  %v721_v50 = vpop.f32.mrf.mxu3 }
  0xba   : > { %v722_v51 = vadd.f32 %v721_v50, %v709_v48 }
  0xbf   : > { %v710_v52 = vpop.f32.mrf.mxu2  ;;  %v734_v4 = vpop.f32.mrf.mxu0 }
  0xc0   : > { %v735_v53 = vadd.f32 %v734_v4, %v722_v51  ;;  %v723_v49 = vpop.f32.mrf.mxu3 }
  0xc2   : > { %803 = vst [vmem:[%s208_s4] sm:$0xff] %v735_v53 }
  0xc7   : > { %v736_v54 = vpop.f32.mrf.mxu0 }
  0xd0   : > { %v747_v55 = vpop.f32.mrf.mxu1 }
  0xd1   : > { %v748_v57 = vadd.f32 %v747_v55, %v290_v56 }
  0xd7   : > { %v760_v58 = vpop.f32.mrf.mxu2 }
  0xd8   : > { %v761_v61 = vadd.f32 %v760_v58, %v748_v57  ;;  %v749_v62 = vpop.f32.mrf.mxu1  ;;  %v773_v63 = vpop.f32.mrf.mxu3 }
  0xda   : > { %v774_v0 = vadd.f32 %v773_v63, %v761_v61 }
  0xdf   : > { %v786_v1 = vpop.f32.mrf.mxu0  ;;  %v762_v3 = vpop.f32.mrf.mxu2 }
  0xe0   : > { %v787_v2 = vadd.f32 %v786_v1, %v774_v0  ;;  %v775_v5 = vpop.f32.mrf.mxu3  ;;  %v799_v6 = vpop.f32.mrf.mxu1 }
  0xe2   : > { %v800_v7 = vadd.f32 %v799_v6, %v787_v2 }
  0xe4   : > { %804 = vst [vmem:[%s208_s4 + $0x8] sm:$0xff] %v800_v7 }
  0xe7   : > { %v788_v8 = vpop.f32.mrf.mxu0 }
  0xe8   : > { %v801_v9 = vpop.f32.mrf.mxu1 }
  0xe9 PF: > { %s13_s14 = sadd.s32 1, %s1314_s14   ;;  %s1558_s12 = smov %s1310_s13 }
  0xea   : > { %p10_p5 = scmp.ge.s32.totalorder %s13_s14, 4   ;;  %s1559_s13 = smov %s1561_s15 }
  0xec   :  { %12 = sbr.rel (!%p10_p5) target bundleno = 2 (0x2), region = 62 }

</bundles_post_ra>
